<compile_context>
chip_gen: v7x
topology: tpu7x:2x2x1
jax: 0.10.0
libtpu: 0.0.40
codegen_flags: <defaults>
</compile_context>

<pallas_src>
import math

import jax
import jax.numpy as jnp
from jax import lax
from jax.experimental import pallas as pl
from jax.experimental.pallas import tpu as pltpu

_INV_SQRT2 = 1.0 / math.sqrt(2.0)


def _round_up(x, n):
    return (x + n - 1) // n * n


def _working_set_bytes(tm, th, d_in, d_out, act_itemsize, w_itemsize):
    """Double-buffered streaming tiles + f32 accumulator scratch."""
    return (2 * tm * d_in * act_itemsize            # x tile
            + 2 * (d_in * th + th) * w_itemsize     # w1 col-slice + b1 slice
            + 2 * (th * d_out + d_out) * w_itemsize # w2 row-slice + b2
            + 2 * tm * d_out * act_itemsize         # out tile
            + tm * d_out * 4)                       # f32 accumulator


def _choose_tiles(m, d_in, d_hid, d_out, act_itemsize, w_itemsize,
                  vmem_budget=32 * 1024 * 1024):
    """Pick (tm, th): prioritize a large M tile, then the largest hidden tile
    whose double-buffered working set fits the VMEM budget (v7x-safe)."""
    m8 = _round_up(max(m, 1), 8)
    dh128 = _round_up(d_hid, 128)
    for tm_c in (512, 384, 256, 128, 64, 32, 16, 8):
        tm = min(tm_c, m8)
        for th_c in (2048, 1536, 1024, 512, 256, 128):
            th = min(th_c, dh128)
            if _working_set_bytes(tm, th, d_in, d_out,
                                  act_itemsize, w_itemsize) <= vmem_budget:
                # v7x has 2 TensorCores: keep >= 2 parallel M steps when M is
                # big enough to be worth splitting.
                if m8 >= 256 and m8 // tm < 2:
                    tm = _round_up((m8 + 1) // 2, 8)
                return tm, th
    return 8, min(128, dh128)


def _mlp_kernel(x_ref, w1_ref, b1_ref, w2_ref, b2_ref, o_ref, acc_ref):
    h_idx = pl.program_id(1)

    @pl.when(h_idx == 0)
    def _():
        acc_ref[...] = jnp.zeros_like(acc_ref)

    # fc1 partial: (tm, d_in) @ (d_in, th) -> f32 accumulate on the MXU
    h = jnp.dot(x_ref[...], w1_ref[...], preferred_element_type=jnp.float32)
    h = h + b1_ref[...].astype(jnp.float32)
    # exact (erf-based) GELU, matching torch.nn.functional.gelu default
    # TODO(synk): on v5e, a tanh-approx GELU would offload work to the EUP slot.
    h = 0.5 * h * (1.0 + lax.erf(h * _INV_SQRT2))
    # fc2 partial: (tm, th) @ (th, d_out), accumulated over hidden tiles
    acc_ref[...] += jnp.dot(h.astype(w2_ref.dtype), w2_ref[...],
                            preferred_element_type=jnp.float32)

    @pl.when(h_idx == pl.num_programs(1) - 1)
    def _():
        o_ref[...] = (acc_ref[...]
                      + b2_ref[...].astype(jnp.float32)).astype(o_ref.dtype)


def mlp_pallas(x, w1, b1, w2, b2, *, tm=None, th=None, return_residual=False):
    """x: (..., in_features). w1: (in, hidden), b1: (hidden,),
       w2: (hidden, out), b2: (out,).  Weights are stored transposed to
       (in, out), equivalent to PyTorch's x @ W.T + b."""
    orig_shape = x.shape
    d_in = orig_shape[-1]
    d_hid = w1.shape[1]
    d_out = w2.shape[1]

    x2d = x.reshape(-1, d_in)
    m = x2d.shape[0]

    auto_tm, auto_th = _choose_tiles(m, d_in, d_hid, d_out,
                                     x.dtype.itemsize, w1.dtype.itemsize)
    tm = auto_tm if tm is None else tm
    th = auto_th if th is None else th

    # Pad M and the hidden dim so any shape can use performance-optimal tiles.
    m_pad = _round_up(m, tm)
    dh_pad = _round_up(d_hid, th)
    if m_pad != m:
        x2d = jnp.pad(x2d, ((0, m_pad - m), (0, 0)))
    if dh_pad != d_hid:
        pad_h = dh_pad - d_hid
        w1 = jnp.pad(w1, ((0, 0), (0, pad_h)))
        b1 = jnp.pad(b1, ((0, pad_h),))
        w2 = jnp.pad(w2, ((0, pad_h), (0, 0)))

    b1_2d = b1.reshape(1, dh_pad)
    b2_2d = b2.reshape(1, d_out)

    working = _working_set_bytes(tm, th, d_in, d_out,
                                 x.dtype.itemsize, w1.dtype.itemsize)
    vmem_limit = int(min(64 * 1024 * 1024,
                         max(2 * working + (2 << 20), 32 * 1024 * 1024)))

    grid = (m_pad // tm, dh_pad // th)

    out2d = pl.pallas_call(
        _mlp_kernel,
        out_shape=jax.ShapeDtypeStruct((m_pad, d_out), x.dtype),
        grid_spec=pltpu.PrefetchScalarGridSpec(
            num_scalar_prefetch=0,
            grid=grid,
            in_specs=[
                pl.BlockSpec((tm, d_in), lambda i, h: (i, 0)),    # x rows
                pl.BlockSpec((d_in, th), lambda i, h: (0, h)),    # w1 col-slice
                pl.BlockSpec((1, th), lambda i, h: (0, h)),       # b1 slice
                pl.BlockSpec((th, d_out), lambda i, h: (h, 0)),   # w2 row-slice
                pl.BlockSpec((1, d_out), lambda i, h: (0, 0)),    # b2
            ],
            out_specs=pl.BlockSpec((tm, d_out), lambda i, h: (i, 0)),
            scratch_shapes=[pltpu.VMEM((tm, d_out), jnp.float32)],
        ),
        compiler_params=pltpu.CompilerParams(
            dimension_semantics=("parallel", "arbitrary"),
            vmem_limit_bytes=vmem_limit,
        ),
    )(x2d, w1, b1_2d, w2, b2_2d)

    y = out2d[:m].reshape(*orig_shape[:-1], d_out)
    return (y, x) if return_residual else y


def init_mlp_params(key, in_features, hidden_features=None, out_features=None,
                    dtype=jnp.float32):
    """PyTorch nn.Linear default init; weights returned transposed to (in, out)."""
    out_features = out_features if out_features is not None else in_features
    hidden_features = (hidden_features if hidden_features is not None
                       else in_features * 4)
    k1, k2, k3, k4 = jax.random.split(key, 4)
    lim1 = 1.0 / math.sqrt(in_features)
    lim2 = 1.0 / math.sqrt(hidden_features)
    w1 = jax.random.uniform(k1, (in_features, hidden_features), dtype,
                            minval=-lim1, maxval=lim1)
    b1 = jax.random.uniform(k2, (hidden_features,), dtype,
                            minval=-lim1, maxval=lim1)
    w2 = jax.random.uniform(k3, (hidden_features, out_features), dtype,
                            minval=-lim2, maxval=lim2)
    b2 = jax.random.uniform(k4, (out_features,), dtype,
                            minval=-lim2, maxval=lim2)
    return w1, b1, w2, b2


def mlp_reference(x, w1, b1, w2, b2):
    h = x @ w1 + b1
    h = 0.5 * h * (1.0 + lax.erf(h * _INV_SQRT2))
    return h @ w2 + b2


if __name__ == "__main__":
    key = jax.random.PRNGKey(0)
    kx1, kp1, kx2, kp2 = jax.random.split(key, 4)

    # --- Test 1: small f32 MLP, auto tiling (batch=2, seq=8, in=32, hidden=128)
    batch, seq, d_in = 2, 8, 32
    x = jax.random.normal(kx1, (batch, seq, d_in), jnp.float32)
    w1, b1, w2, b2 = init_mlp_params(kp1, d_in)
    y = jax.block_until_ready(mlp_pallas(x, w1, b1, w2, b2))
    y_ref = mlp_reference(x, w1, b1, w2, b2)
    assert y.shape == (batch, seq, d_in)
    assert jnp.allclose(y, y_ref, atol=1e-4, rtol=1e-4), "f32 mismatch"

    # --- Test 2: force multi-step grid on both axes (M tiles + hidden reduction)
    batch2, seq2, din2, dhid2 = 2, 16, 64, 256
    x2 = jax.random.normal(kx2, (batch2, seq2, din2), jnp.float32)
    p2 = init_mlp_params(kp2, din2, hidden_features=dhid2)
    y2 = jax.block_until_ready(mlp_pallas(x2, *p2, tm=8, th=128))
    y2_ref = mlp_reference(x2, *p2)
    assert jnp.allclose(y2, y2_ref, atol=1e-4, rtol=1e-4), "tiled mismatch"

    # --- Test 3: bf16 operands (MXU-friendly path), f32 accumulation
    xb = x.astype(jnp.bfloat16)
    pb = tuple(p.astype(jnp.bfloat16) for p in (w1, b1, w2, b2))
    yb = jax.block_until_ready(mlp_pallas(xb, *pb))
    yb_ref = mlp_reference(*(a.astype(jnp.float32) for a in (xb, *pb)))
    assert jnp.allclose(yb.astype(jnp.float32), yb_ref,
                        atol=5e-2, rtol=5e-2), "bf16 mismatch"

    # --- return_residual path (matches the PyTorch flag)
    yr, res = mlp_pallas(x, w1, b1, w2, b2, return_residual=True)
    assert res is x and yr.shape == y.shape

    print("KERNEL_OK")
</pallas_src>

<mosaic_0001>
module attributes {stable_mosaic.version = 11 : i64} {
  func.func @_mlp_kernel(%arg0: i32, %arg1: i32, %arg2: memref<16x32xf32, #tpu.memory_space<vmem>>, %arg3: memref<32x128xf32, #tpu.memory_space<vmem>>, %arg4: memref<1x128xf32, #tpu.memory_space<vmem>>, %arg5: memref<128x32xf32, #tpu.memory_space<vmem>>, %arg6: memref<1x32xf32, #tpu.memory_space<vmem>>, %arg7: memref<16x32xf32, #tpu.memory_space<vmem>>, %arg8: memref<16x32xf32, #tpu.memory_space<vmem>>) attributes {dimension_semantics = [#tpu.dimension_semantics<parallel>, #tpu.dimension_semantics<arbitrary>], iteration_bounds = array<i64: 1, 1>, scalar_prefetch = 0 : i64, scratch_operands = 1 : i64, tpu.core_type = #tpu.core_type<tc>, window_params = [{transform_indices = @transform_0, window_bounds = array<i64: 16, 32>}, {transform_indices = @transform_1, window_bounds = array<i64: 32, 128>}, {transform_indices = @transform_2, window_bounds = array<i64: 1, 128>}, {transform_indices = @transform_3, window_bounds = array<i64: 128, 32>}, {pipeline_mode = #tpu.pipeline_mode<synchronous>, transform_indices = @transform_4, window_bounds = array<i64: 1, 32>}, {transform_indices = @transform_5, window_bounds = array<i64: 16, 32>}]} {
    %c0_i32 = arith.constant 0 : i32
    %0 = arith.cmpi eq, %arg1, %c0_i32 : i32
    %1 = arith.extui %0 : i1 to i32
    %c0_i32_0 = arith.constant 0 : i32
    %2 = arith.cmpi ne, %1, %c0_i32_0 : i32
    scf.if %2 {
      %cst_18 = arith.constant 0.000000e+00 : f32
      %25 = vector.broadcast %cst_18 : f32 to vector<16x32xf32>
      %c0_19 = arith.constant 0 : index
      %c0_20 = arith.constant 0 : index
      %26 = vector.load %arg8[%c0_19, %c0_20] : memref<16x32xf32, #tpu.memory_space<vmem>>, vector<16x32xf32>
      tpu.vector_store %arg8[%c0_19, %c0_20], %25 {strides = array<i32>} : memref<16x32xf32, #tpu.memory_space<vmem>>, vector<16x32xf32>,
    } else {
    }
    %c0 = arith.constant 0 : index
    %c0_1 = arith.constant 0 : index
    %3 = vector.load %arg2[%c0, %c0_1] : memref<16x32xf32, #tpu.memory_space<vmem>>, vector<16x32xf32>
    %c0_2 = arith.constant 0 : index
    %c0_3 = arith.constant 0 : index
    %4 = vector.load %arg3[%c0_2, %c0_3] : memref<32x128xf32, #tpu.memory_space<vmem>>, vector<32x128xf32>
    %cst = arith.constant dense<0.000000e+00> : vector<16x128xf32>
    %5 = tpu.matmul %3, %4, %cst {dimension_numbers = #tpu.dot_dimension_numbers<[1], [0], [0], [1], [0, 0, 1, 1], [], []>} : vector<16x32xf32>, vector<32x128xf32>, vector<16x128xf32> -> vector<16x128xf32>
    %c0_4 = arith.constant 0 : index
    %c0_5 = arith.constant 0 : index
    %6 = vector.load %arg4[%c0_4, %c0_5] : memref<1x128xf32, #tpu.memory_space<vmem>>, vector<1x128xf32>
    %7 = vector.broadcast %6 : vector<1x128xf32> to vector<16x128xf32>
    %8 = arith.addf %5, %7 : vector<16x128xf32>
    %cst_6 = arith.constant 5.000000e-01 : f32
    %9 = vector.broadcast %cst_6 : f32 to vector<16x128xf32>
    %10 = arith.mulf %9, %8 : vector<16x128xf32>
    %cst_7 = arith.constant 0.707106769 : f32
    %11 = vector.broadcast %cst_7 : f32 to vector<16x128xf32>
    %12 = arith.mulf %8, %11 : vector<16x128xf32>
    %13 = math.erf %12 : vector<16x128xf32>
    %cst_8 = arith.constant 1.000000e+00 : f32
    %14 = vector.broadcast %cst_8 : f32 to vector<16x128xf32>
    %15 = arith.addf %14, %13 : vector<16x128xf32>
    %16 = arith.mulf %10, %15 : vector<16x128xf32>
    %c0_9 = arith.constant 0 : index
    %c0_10 = arith.constant 0 : index
    %17 = vector.load %arg8[%c0_9, %c0_10] : memref<16x32xf32, #tpu.memory_space<vmem>>, vector<16x32xf32>
    %c0_11 = arith.constant 0 : index
    %c0_12 = arith.constant 0 : index
    %18 = vector.load %arg5[%c0_11, %c0_12] : memref<128x32xf32, #tpu.memory_space<vmem>>, vector<128x32xf32>
    %cst_13 = arith.constant dense<0.000000e+00> : vector<16x32xf32>
    %19 = tpu.matmul %16, %18, %cst_13 {dimension_numbers = #tpu.dot_dimension_numbers<[1], [0], [0], [1], [0, 0, 1, 1], [], []>} : vector<16x128xf32>, vector<128x32xf32>, vector<16x32xf32> -> vector<16x32xf32>
    %20 = arith.addf %17, %19 : vector<16x32xf32>
    %c0_14 = arith.constant 0 : index
    %c0_15 = arith.constant 0 : index
    %21 = vector.load %arg8[%c0_14, %c0_15] : memref<16x32xf32, #tpu.memory_space<vmem>>, vector<16x32xf32>
    tpu.vector_store %arg8[%c0_14, %c0_15], %20 {strides = array<i32>} : memref<16x32xf32, #tpu.memory_space<vmem>>, vector<16x32xf32>,
    %c0_i32_16 = arith.constant 0 : i32
    %22 = arith.cmpi eq, %arg1, %c0_i32_16 : i32
    %23 = arith.extui %22 : i1 to i32
    %c0_i32_17 = arith.constant 0 : i32
    %24 = arith.cmpi ne, %23, %c0_i32_17 : i32
    scf.if %24 {
      %c0_18 = arith.constant 0 : index
      %c0_19 = arith.constant 0 : index
      %25 = vector.load %arg8[%c0_18, %c0_19] : memref<16x32xf32, #tpu.memory_space<vmem>>, vector<16x32xf32>
      %c0_20 = arith.constant 0 : index
      %c0_21 = arith.constant 0 : index
      %26 = vector.load %arg6[%c0_20, %c0_21] : memref<1x32xf32, #tpu.memory_space<vmem>>, vector<1x32xf32>
      %27 = vector.broadcast %26 : vector<1x32xf32> to vector<16x32xf32>
      %28 = arith.addf %25, %27 : vector<16x32xf32>
      %c0_22 = arith.constant 0 : index
      %c0_23 = arith.constant 0 : index
      %29 = vector.load %arg7[%c0_22, %c0_23] : memref<16x32xf32, #tpu.memory_space<vmem>>, vector<16x32xf32>
      tpu.vector_store %arg7[%c0_22, %c0_23], %28 {strides = array<i32>} : memref<16x32xf32, #tpu.memory_space<vmem>>, vector<16x32xf32>,
    } else {
    }
    return
  }
  func.func @transform_0(%arg0: i32, %arg1: i32) -> (i32, i32) {
    %c0_i32 = arith.constant 0 : i32
    %c0_i32_0 = arith.constant 0 : i32
    return %arg0, %c0_i32 : i32, i32
  }
  func.func @transform_1(%arg0: i32, %arg1: i32) -> (i32, i32) {
    %c0_i32 = arith.constant 0 : i32
    %c0_i32_0 = arith.constant 0 : i32
    return %c0_i32, %arg1 : i32, i32
  }
  func.func @transform_2(%arg0: i32, %arg1: i32) -> (i32, i32) {
    %c0_i32 = arith.constant 0 : i32
    %c0_i32_0 = arith.constant 0 : i32
    return %c0_i32, %arg1 : i32, i32
  }
  func.func @transform_3(%arg0: i32, %arg1: i32) -> (i32, i32) {
    %c0_i32 = arith.constant 0 : i32
    %c0_i32_0 = arith.constant 0 : i32
    return %arg1, %c0_i32 : i32, i32
  }
  func.func @transform_4(%arg0: i32, %arg1: i32) -> (i32, i32) {
    %c0_i32 = arith.constant 0 : i32
    %c0_i32_0 = arith.constant 0 : i32
    %c0_i32_1 = arith.constant 0 : i32
    return %c0_i32, %c0_i32_0 : i32, i32
  }
  func.func @transform_5(%arg0: i32, %arg1: i32) -> (i32, i32) {
    %c0_i32 = arith.constant 0 : i32
    %c0_i32_0 = arith.constant 0 : i32
    return %arg0, %c0_i32 : i32, i32
  }
}

</mosaic_0001>

<bundles_post_ra>
// kernel: tpu_custom_call.1
= control target key start
LH: loop header
LB: loop body
LE: loop exit
PB: predicated region body
PF: predicated region fallthrough
CT: control target
= control target key end

     0   :  { %vm25_vm0 = vcmask 261120   ;;  %s534_s0 = inlined_call_operand.vmem [shape: f32[16,32], index: 0, kind: input, shape index: {}]   ;;  %s535_s1 = inlined_call_operand.vmem [shape: f32[32,128], index: 1, kind: input, shape index: {}]   ;;  %s536_s2 = inlined_call_operand.vmem [shape: f32[1,128], index: 2, kind: input, shape index: {}]   ;;  %s537_s3 = inlined_call_operand.vmem [shape: f32[128,32], index: 3, kind: input, shape index: {}]   ;;  %s538_s4 = inlined_call_operand.vmem [shape: f32[1,32], index: 4, kind: input, shape index: {}]   ;;  %s539_s5 = inlined_call_operand.hbm [shape: f32[16,32], index: 5, kind: output, shape index: {}]  }
   0x1   :  { %v30_v0 = vld [vmem:[%s535_s1] sm:$0xff]  ;;  %v31_v1 = vld [vmem:[%s535_s1 + $0x8] sm:$0xff]  ;;  %v32_v2 = vld [vmem:[%s535_s1 + $0x10] sm:$0xff] }
   0x2   :  { %v336_v3 = vpack.c.bf16 %v31_v1, %v30_v0  ;;  %v33_v4 = vld [vmem:[%s535_s1 + $0x18] sm:$0xff]  ;;  %v28_v5 = vld [vmem:[%s534_s0] sm:$0xff]  ;;  %v136_v8 = vld [vmem:[%s537_s3 + $0x8] sm:$0xff] }
   0x3   :  { %v340_v6 = vpack.c.bf16 %v33_v4, %v32_v2  ;;  %298 = vmatprep.mubr.msk.f32.mxu0 %vm25_vm0, %v28_v5  ;;  %v135_v7 = vld [vmem:[%s537_s3] sm:$0xff]  ;;  %v137_v9 = vld [vmem:[%s537_s3 + $0x10] sm:$0xff]  ;;  %v138_v11 = vld [vmem:[%s537_s3 + $0x18] sm:$0xff] }
   0x4   :  { %337 = vmatprep.subr.bf16.mxu0 %v336_v3  ;;  %v344_v10 = vpack.c.bf16 %v136_v8, %v135_v7  ;;  %v348_v12 = vpack.c.bf16 %v138_v11, %v137_v9  ;;  %v139_v13 = vld [vmem:[%s537_s3 + $0x20] sm:$0xff]  ;;  %v140_v14 = vld [vmem:[%s537_s3 + $0x28] sm:$0xff] }
   0x5   :  { %339 = vmatpush3.bf16.msra.mxu0 %v336_v3 }
   0x6   :  { %10 = vsyncpa [#allocation4], 0  ;;  %341 = vmatprep.subr.bf16.mxu0 %v340_v6  ;;  %345 = vmatprep.subr.bf16.mxu1 %v344_v10  ;;  %v352_v15 = vpack.c.bf16 %v140_v14, %v139_v13  ;;  %v29_v16 = vld [vmem:[%s534_s0 + $0x8] sm:$0xff]  ;;  %v141_v17 = vld [vmem:[%s537_s3 + $0x30] sm:$0xff]  ;;  %v408_v32 = vmov 0.0   ;;  %s409_s11 = smov [#allocation3]  }
   0x7   :  { %347 = vmatpush3.bf16.msra.mxu1 %v344_v10  ;;  %v142_v18 = vld [vmem:[%s537_s3 + $0x38] sm:$0xff]  ;;  %v143_v20 = vld [vmem:[%s537_s3 + $0x40] sm:$0xff]  ;;  %v144_v21 = vld [vmem:[%s537_s3 + $0x48] sm:$0xff]  ;;  %27 = vst.msk [vmem:[#allocation2 + $0x8] sm:$0xff] %vm25_vm0, %v408_v32  ;;  %s251_s12 = sshll.u32 %s409_s11, 4  ;;  %s252_s12 = int_to_ptr.vmem [resolvable:$true] %s251_s12 }
   0x8   :  { %349 = vmatprep.subr.bf16.mxu1 %v348_v12  ;;  %v356_v19 = vpack.c.bf16 %v142_v18, %v141_v17  ;;  %v360_v22 = vpack.c.bf16 %v144_v21, %v143_v20  ;;  %v145_v23 = vld [vmem:[%s537_s3 + $0x50] sm:$0xff]  ;;  %v146_v24 = vld [vmem:[%s537_s3 + $0x58] sm:$0xff]  ;;  %v147_v26 = vld [vmem:[%s537_s3 + $0x60] sm:$0xff]  ;;  %26 = vst.msk [vmem:[#allocation2] sm:$0xff] %vm25_vm0, %v408_v32  ;;  %s384_s13 = scalar_lea.vmem %s252_s12, 256  ;;  %p389_p1 = scmp.lt.s32.totalorder %s252_s12, %s252_s12 }
   0x9   :  { %343 = vmatpush3.bf16.msra.mxu0 %v340_v6  ;;  %v364_v25 = vpack.c.bf16 %v146_v24, %v145_v23  ;;  %v148_v27 = vld [vmem:[%s537_s3 + $0x68] sm:$0xff]  ;;  %v149_v29 = vld [vmem:[%s537_s3 + $0x70] sm:$0xff]  ;;  %v150_v30 = vld [vmem:[%s537_s3 + $0x78] sm:$0xff]  ;;  %p385_p0 = scmp.ne.s32.totalorder %s252_s12, %s384_s13  ;;  %p390_p2 = scmp.lt.s32.totalorder %s384_s13, %s384_s13 }
   0xa   :  { %v368_v28 = vpack.c.bf16 %v148_v27, %v147_v26  ;;  %v372_v31 = vpack.c.bf16 %v150_v30, %v149_v29  ;;  %v262_v33 = vld [vmem:[%s536_s2] ss:$0 sm:$0xff] }
   0xb   :  { %351 = vmatpush3.bf16.msra.mxu1 %v348_v12  ;;  %v265_v54 = vld [vmem:[%s538_s4] ss:$0 sm:$0xff]  ;;  %p391_p3 = por %p390_p2, %p389_p1 }
   0xc   :  { %299 = vmatmul.mubr.msk.f32.vlgmr.msra.gmra.mrb[0].mxu0 %vm25_vm0, %v29_v16  ;;  %353 = vmatprep.subr.bf16.mxu1 %v352_v15 }
   0xd   :  { %p392_p4 = pnand %p391_p3, %p385_p0 }
   0xe   :  { %v134_v48 = vld [vmem:[#allocation2 + $0x8] sm:$0xff] }
   0xf   :  { %355 = vmatpush3.bf16.msra.mxu1 %v352_v15  ;;  %v133_v49 = vld [vmem:[#allocation2] sm:$0xff] }
  0x10   :  { %357 = vmatprep.subr.bf16.mxu1 %v356_v19 }
  0x13   :  { %359 = vmatpush3.bf16.msra.mxu1 %v356_v19 }
  0x14   :  { %361 = vmatprep.subr.bf16.mxu1 %v360_v22 }
  0x17   :  { %363 = vmatpush3.bf16.msra.mxu1 %v360_v22 }
  0x18   :  { %365 = vmatprep.subr.bf16.mxu1 %v364_v25 }
  0x1b   :  { %367 = vmatpush3.bf16.msra.mxu1 %v364_v25 }
  0x1c   :  { %369 = vmatprep.subr.bf16.mxu1 %v368_v28 }
  0x1f   :  { %371 = vmatpush3.bf16.msra.mxu1 %v368_v28 }
  0x20   :  { %373 = vmatprep.subr.bf16.mxu1 %v372_v31 }
  0x23   :  { %375 = vmatpush3.bf16.msra.mxu1 %v372_v31 }
  0xdf   :  { %v300_v34 = vpop.f32.mrb[0].mxu0 }
  0xe0   :  { %v120_v35 = vadd.f32 %v300_v34, %v262_v33  ;;  %v114_v36 = vpop.f32.mrb[1].mxu0 }
  0xe1   :  { %v115_v37 = vadd.f32 %v262_v33, %v114_v36 }
  0xe2   :  { %v126_v38 = vmul.f32 0.70710677, %v120_v35  ;;  %v124_v45 = vmul.f32 0.5, %v120_v35 }
  0xe3   :  { %v125_v39 = vmul.f32 0.70710677, %v115_v37  ;;  %v123_v43 = vmul.f32 0.5, %v115_v37 }
  0xe4   :  { %380 = verf.f32 %v126_v38 }
  0xe5   :  { %382 = verf.f32 %v125_v39 }
  0xee   :  { %v381_v40 = vpop.eup %380 }
  0xef   :  { %v383_v41 = vpop.eup %382  ;;  %v130_v42 = vadd.f32 1.0, %v381_v40 }
  0xf0   :  { %v129_v44 = vadd.f32 1.0, %v383_v41 }
  0xf1   :  { %v132_v47 = vmul.f32 %v130_v42, %v124_v45 }
  0xf2   :  { %v131_v46 = vmul.f32 %v129_v44, %v123_v43 }
  0xf4   :  { %333 = vmatprep.mubr.f32.mxu1 %v131_v46 }
  0xf5   :  { %334 = vmatmul.mubr.f32.vlgmr.msra.gmra.mrb[0].mxu1 %v132_v47 }
 0x1c8   :  { %v335_v50 = vpop.f32.mrb[0].mxu1 }
 0x1c9   :  { %v227_v51 = vadd.f32 %v335_v50, %v134_v48  ;;  %v217_v52 = vpop.f32.mrb[1].mxu1 }
 0x1ca   :  { %v226_v53 = vadd.f32 %v217_v52, %v133_v49 }
 0x1cb   :  { %229 = vst.msk [vmem:[#allocation2 + $0x8] sm:$0xff] %vm25_vm0, %v227_v51 }
 0x1cc   :  { %228 = vst.msk [vmem:[#allocation2] sm:$0xff] %vm25_vm0, %v226_v53 }
 0x1d2   :  { %v234_v55 = vld [vmem:[#allocation2 + $0x8] sm:$0xff] }
 0x1d3   :  { %v233_v56 = vld [vmem:[#allocation2] sm:$0xff]  ;;  %v243_v57 = vadd.f32 %v265_v54, %v234_v55 }
 0x1d4   :  { %v242_v58 = vadd.f32 %v265_v54, %v233_v56 }
 0x1d5   :  { %245 = vst.msk [vmem:[#allocation3 + $0x8] sm:$0xff] %vm25_vm0, %v243_v57 }
 0x1d6   :  { %244 = vst.msk [vmem:[#allocation3] sm:$0xff] %vm25_vm0, %v242_v58 }
 0x1d7   :  { %395 = shalt.err (!%p392_p4)
}
 0x1d8   :  { %s396_s15 = scalar_lea.hbm %s539_s5, 256 }
 0x1d9   :  { %p397_p5 = scmp.ne.s32.totalorder %s539_s5, %s396_s15  ;;  %p400_p6 = scmp.lt.u32.totalorder %s396_s15, %s539_s5 }
 0x1db   :  { %p402_p7 = pnand %p400_p6, %p397_p5 }
 0x1dd   :  { %405 = shalt.err (!%p402_p7)
}
 0x1de   :  { %s410_s20 = smov 128   ;;  %s411_s21 = smov 8  }
 0x1df   :  { %257 = dma.vmem_to_hbm [thread:$0]  %s252_s12, 256, %s539_s5, [#allocation4], %s410_s20, %s410_s20, %s411_s21  }
 0x1e0   :  { %406 = dma.done.wait [#allocation4], 256  }
 0x1e1   :  { %407 = vsyncadd [#allocation4], 4294967040 }
 0x1e2   :  { %261 = vsyncpa [#allocation4], 1 }

</bundles_post_ra>
